<compile_context>
chip_gen: v7x
topology: tpu7x:2x2x1
jax: 0.10.0
libtpu: 0.0.40
codegen_flags: <defaults>
</compile_context>

<pallas_src>
import math
from functools import partial

import jax
import jax.numpy as jnp
import numpy as np
from jax import lax
from jax.experimental import pallas as pl
from jax.experimental.pallas import tpu as pltpu

_BN_EPS = 1e-5


def _gconv_bn_relu(x, sym_e, diag_e, wcat, m, ebs, ebd):
    """One GraphConv block: _GraphConv -> BatchNorm1d(batch stats) -> ReLU."""
    B, N, Din = x.shape
    Dout = m.shape[1]

    # Merged projection: h1 = x @ W1, hdiff = x @ (W0 - W1)   (one MXU matmul)
    h = jnp.dot(x.reshape(B * N, Din), wcat,
                preferred_element_type=jnp.float32).reshape(B, N, 2 * Dout)
    mh1 = m[None, :, :] * h[:, :, :Dout]      # M * h1
    mhd = m[None, :, :] * h[:, :, Dout:]      # M * (h0 - h1)

    # edge_features = sym(e + edge_b) = sym(e) + sym(edge_b)
    ef = sym_e + ebs[None, :, :]              # (B, N, N)
    d = (diag_e + ebd)[:, :, None]            # diag(ef): (B, N, 1)

    # diag/off-diag split collapsed into one batched matmul + broadcast scale
    out = jnp.einsum('bij,bje->bie', ef, mh1,
                     preferred_element_type=jnp.float32) + d * mhd
    # NOTE: the _GraphConv bias is omitted -- a per-channel constant added
    # before a batch-stat BatchNorm (gamma=1, beta=0) is exactly cancelled.

    # BatchNorm1d over the channel dim, single-pass biased batch statistics.
    inv_cnt = 1.0 / (B * N)
    mean = jnp.sum(out, axis=(0, 1), keepdims=True) * inv_cnt
    ex2 = jnp.sum(out * out, axis=(0, 1), keepdims=True) * inv_cnt
    var = ex2 - mean * mean
    xhat = (out - mean) * lax.rsqrt(var + _BN_EPS)

    return jnp.maximum(xhat, 0.0)             # ReLU


def make_encoder_kernel(num_res_layer):
    """Builds the fully fused encoder kernel (res blocks statically unrolled)."""

    def kernel(*refs):
        v_ref, e_ref = refs[0], refs[1]
        o_ref = refs[-1]
        prefs = refs[2:-1]                    # 4 refs per layer: wcat, M, ebs, ebd

        e = e_ref[...]                        # (B, N, N)
        B, N, _ = e.shape

        # Edge preprocessing hoisted out of the per-layer body (once per call).
        sym_e = (jnp.swapaxes(e, 1, 2) + e) * 0.5
        row = lax.broadcasted_iota(jnp.int32, (N, N), 0)
        col = lax.broadcasted_iota(jnp.int32, (N, N), 1)
        eye = (row == col).astype(jnp.float32)
        diag_e = jnp.sum(e * eye[None, :, :], axis=-1)     # (B, N)

        def layer(i, x):
            wcat = prefs[4 * i][...]
            m = prefs[4 * i + 1][...]
            ebs = prefs[4 * i + 2][...]
            ebd = prefs[4 * i + 3][...]
            return _gconv_bn_relu(x, sym_e, diag_e, wcat, m, ebs, ebd)

        x = layer(0, v_ref[...])              # input layer
        li = 1
        for _ in range(num_res_layer):        # unrolled ResGraphConv blocks
            h = layer(li, x)
            h = layer(li + 1, h)
            x = x + h                         # residual add (in-kernel)
            li += 2
        o_ref[...] = layer(li, x)             # output layer

    return kernel


def _prep_layer(p):
    """Tiny layer-local parameter repacking (runs once under jit, outside kernel)."""
    W = p['W']                                           # (2, Din, Dout)
    wcat = jnp.concatenate([W[1], W[0] - W[1]], axis=1)  # (Din, 2*Dout)
    eb = p['edge_b']                                     # (N, N)
    ebs = (eb + eb.T) * 0.5                              # sym(edge_b)
    ebd = jnp.diagonal(eb)[None, :]                      # (1, N) = diag(edge_b)
    return [wcat, p['M'], ebs, ebd]


@partial(jax.jit, static_argnums=(3,))
def res_graph_encoder(v, e, params, num_res_layer):
    B, N, _ = v.shape
    layer_params = [params['input_layer']]
    for l in range(num_res_layer):
        layer_params.append(params[f'res_{l}']['gconv1'])
        layer_params.append(params[f'res_{l}']['gconv2'])
    layer_params.append(params['output_layer'])

    flat = []
    for p in layer_params:
        flat += _prep_layer(p)

    out_dim = params['output_layer']['W'].shape[2]
    vmem = pl.BlockSpec(memory_space=pltpu.MemorySpace.VMEM)
    return pl.pallas_call(
        make_encoder_kernel(num_res_layer),
        out_shape=jax.ShapeDtypeStruct((B, N, out_dim), jnp.float32),
        in_specs=[vmem] * (2 + len(flat)),
        out_specs=vmem,
    )(v, e, *flat)


# ------------------- pure-JAX reference (mirrors PyTorch) -------------------

_HI = jax.lax.Precision.HIGHEST


def _reference_block(x, e, p):
    """GraphConv: _GraphConv(+bias) -> BatchNorm1d(train, gamma=1,beta=0) -> ReLU."""
    W, M, edge_b, bias = p['W'], p['M'], p['edge_b'], p['bias']
    N = e.shape[1]
    h0 = jnp.matmul(x, W[0], precision=_HI)
    h1 = jnp.matmul(x, W[1], precision=_HI)
    ef = e + edge_b[None, :, :]
    ef = (jnp.transpose(ef, (0, 2, 1)) + ef) / 2.0
    E = jnp.eye(N, dtype=jnp.float32)
    out = (jnp.matmul(ef * E, M * h0, precision=_HI)
           + jnp.matmul(ef * (1.0 - E), M * h1, precision=_HI))
    out = out + bias[None, None, :]
    mean = out.mean(axis=(0, 1), keepdims=True)
    var = ((out - mean) ** 2).mean(axis=(0, 1), keepdims=True)   # biased (training BN)
    out = (out - mean) / jnp.sqrt(var + _BN_EPS)
    return jnp.maximum(out, 0.0)


def reference_encoder(v, e, params, num_res_layer):
    x = _reference_block(v, e, params['input_layer'])
    for l in range(num_res_layer):
        h = _reference_block(x, e, params[f'res_{l}']['gconv1'])
        h = _reference_block(h, e, params[f'res_{l}']['gconv2'])
        x = x + h
    return _reference_block(x, e, params['output_layer'])


# ----------------------- deterministic parameter init -----------------------

def _xavier_uniform(key, shape, gain=1.414):
    # Mirrors torch.nn.init.xavier_uniform_ fan computation.
    if len(shape) > 2:
        rf = 1
        for s in shape[2:]:
            rf *= s
        fan_in, fan_out = shape[1] * rf, shape[0] * rf
    else:
        fan_in, fan_out = shape[0], shape[1]
    bound = gain * math.sqrt(6.0 / (fan_in + fan_out))
    return jax.random.uniform(key, shape, jnp.float32, -bound, bound)


def init_graphconv(key, in_f, out_f, n_nodes):
    kw, km, kb = jax.random.split(key, 3)
    stdv = 1.0 / math.sqrt(out_f)
    return {
        'W': _xavier_uniform(kw, (2, in_f, out_f)),
        'M': _xavier_uniform(km, (n_nodes, out_f)),
        'edge_b': jnp.full((n_nodes, n_nodes), 1e-6, jnp.float32),
        # bias is used by the reference; in the kernel it is dropped because it
        # is exactly cancelled by the training-mode BatchNorm that follows.
        'bias': jax.random.uniform(kb, (out_f,), jnp.float32, -stdv, stdv),
    }


if __name__ == "__main__":
    B, N = 2, 6                          # batch, node_number
    input_dim, hidden_dim, output_dim = 16, 32, 8
    num_res_layer = 1

    key = jax.random.PRNGKey(0)
    k_v, k_e, k_p = jax.random.split(key, 3)

    # nodes: IMU-like features (B, N, D); edges: symmetric UWB distances (B, N, N)
    v = jax.random.normal(k_v, (B, N, input_dim), jnp.float32)
    dist = jnp.abs(jax.random.normal(k_e, (B, N, N), jnp.float32))
    e = (dist + jnp.swapaxes(dist, 1, 2)) * 0.5

    keys = jax.random.split(k_p, 2 + 2 * num_res_layer)
    params = {
        'input_layer': init_graphconv(keys[0], input_dim, hidden_dim, N),
        'output_layer': init_graphconv(keys[1], hidden_dim, output_dim, N),
    }
    for l in range(num_res_layer):
        params[f'res_{l}'] = {
            'gconv1': init_graphconv(keys[2 + 2 * l], hidden_dim, hidden_dim, N),
            'gconv2': init_graphconv(keys[3 + 2 * l], hidden_dim, hidden_dim, N),
        }

    out = res_graph_encoder(v, e, params, num_res_layer)
    jax.block_until_ready(out)
    assert out.shape == (B, N, output_dim), out.shape

    # Correctness check against the line-for-line PyTorch-equivalent reference.
    ref = reference_encoder(v, e, params, num_res_layer)
    jax.block_until_ready(ref)
    np.testing.assert_allclose(np.asarray(out), np.asarray(ref),
                               rtol=2e-3, atol=2e-3)

    print("KERNEL_OK")
</pallas_src>

<mosaic_0001>
module attributes {stable_mosaic.version = 11 : i64} {
  func.func @kernel(%arg0: memref<2x6x16xf32, #tpu.memory_space<vmem>>, %arg1: memref<2x6x6xf32, #tpu.memory_space<vmem>>, %arg2: memref<16x64xf32, #tpu.memory_space<vmem>>, %arg3: memref<6x32xf32, #tpu.memory_space<vmem>>, %arg4: memref<6x6xf32, #tpu.memory_space<vmem>>, %arg5: memref<1x6xf32, #tpu.memory_space<vmem>>, %arg6: memref<32x64xf32, #tpu.memory_space<vmem>>, %arg7: memref<6x32xf32, #tpu.memory_space<vmem>>, %arg8: memref<6x6xf32, #tpu.memory_space<vmem>>, %arg9: memref<1x6xf32, #tpu.memory_space<vmem>>, %arg10: memref<32x64xf32, #tpu.memory_space<vmem>>, %arg11: memref<6x32xf32, #tpu.memory_space<vmem>>, %arg12: memref<6x6xf32, #tpu.memory_space<vmem>>, %arg13: memref<1x6xf32, #tpu.memory_space<vmem>>, %arg14: memref<32x16xf32, #tpu.memory_space<vmem>>, %arg15: memref<6x8xf32, #tpu.memory_space<vmem>>, %arg16: memref<6x6xf32, #tpu.memory_space<vmem>>, %arg17: memref<1x6xf32, #tpu.memory_space<vmem>>, %arg18: memref<2x6x8xf32, #tpu.memory_space<vmem>>) attributes {dimension_semantics = [], scalar_prefetch = 0 : i64, scratch_operands = 0 : i64, tpu.core_type = #tpu.core_type<tc>} {
    %c0 = arith.constant 0 : index
    %c0_0 = arith.constant 0 : index
    %c0_1 = arith.constant 0 : index
    %0 = vector.load %arg1[%c0, %c0_0, %c0_1] : memref<2x6x6xf32, #tpu.memory_space<vmem>>, vector<2x6x6xf32>
    %1 = tpu.transpose %0, [0, 2, 1] : vector<2x6x6xf32> -> vector<2x6x6xf32>
    %2 = arith.addf %1, %0 : vector<2x6x6xf32>
    %cst = arith.constant 5.000000e-01 : f32
    %3 = vector.broadcast %cst : f32 to vector<2x6x6xf32>
    %4 = arith.mulf %2, %3 : vector<2x6x6xf32>
    %5 = tpu.iota {dimensions = array<i32: 0>} : vector<6x6xi32>
    %6 = tpu.iota {dimensions = array<i32: 1>} : vector<6x6xi32>
    %7 = arith.cmpi eq, %5, %6 : vector<6x6xi32>
    %8 = arith.extui %7 : vector<6x6xi1> to vector<6x6xi32>
    %9 = arith.sitofp %8 : vector<6x6xi32> to vector<6x6xf32>
    %10 = vector.shape_cast %9 : vector<6x6xf32> to vector<1x6x6xf32>
    %11 = vector.broadcast %10 : vector<1x6x6xf32> to vector<2x6x6xf32>
    %12 = arith.mulf %0, %11 : vector<2x6x6xf32>
    %cst_2 = arith.constant dense<0.000000e+00> : vector<2x6xf32>
    %13 = vector.multi_reduction <add>, %12, %cst_2 [2] : vector<2x6x6xf32> to vector<2x6xf32>
    %c0_3 = arith.constant 0 : index
    %c0_4 = arith.constant 0 : index
    %c0_5 = arith.constant 0 : index
    %14 = vector.load %arg0[%c0_3, %c0_4, %c0_5] : memref<2x6x16xf32, #tpu.memory_space<vmem>>, vector<2x6x16xf32>
    %c0_6 = arith.constant 0 : index
    %c0_7 = arith.constant 0 : index
    %15 = vector.load %arg2[%c0_6, %c0_7] : memref<16x64xf32, #tpu.memory_space<vmem>>, vector<16x64xf32>
    %c0_8 = arith.constant 0 : index
    %c0_9 = arith.constant 0 : index
    %16 = vector.load %arg3[%c0_8, %c0_9] : memref<6x32xf32, #tpu.memory_space<vmem>>, vector<6x32xf32>
    %c0_10 = arith.constant 0 : index
    %c0_11 = arith.constant 0 : index
    %17 = vector.load %arg4[%c0_10, %c0_11] : memref<6x6xf32, #tpu.memory_space<vmem>>, vector<6x6xf32>
    %c0_12 = arith.constant 0 : index
    %c0_13 = arith.constant 0 : index
    %18 = vector.load %arg5[%c0_12, %c0_13] : memref<1x6xf32, #tpu.memory_space<vmem>>, vector<1x6xf32>
    %19 = vector.shape_cast %14 : vector<2x6x16xf32> to vector<12x16xf32>
    %cst_14 = arith.constant dense<0.000000e+00> : vector<12x64xf32>
    %20 = tpu.matmul %19, %15, %cst_14 {dimension_numbers = #tpu.dot_dimension_numbers<[1], [0], [0], [1], [0, 0, 1, 1], [], []>} : vector<12x16xf32>, vector<16x64xf32>, vector<12x64xf32> -> vector<12x64xf32>
    %21 = vector.shape_cast %20 : vector<12x64xf32> to vector<2x6x64xf32>
    %22 = vector.shape_cast %16 : vector<6x32xf32> to vector<1x6x32xf32>
    %23 = vector.extract_strided_slice %21 {offsets = [0, 0, 0], sizes = [2, 6, 32], strides = [1, 1, 1]} : vector<2x6x64xf32> to vector<2x6x32xf32>
    %24 = vector.broadcast %22 : vector<1x6x32xf32> to vector<2x6x32xf32>
    %25 = arith.mulf %24, %23 : vector<2x6x32xf32>
    %26 = vector.shape_cast %16 : vector<6x32xf32> to vector<1x6x32xf32>
    %27 = vector.extract_strided_slice %21 {offsets = [0, 0, 32], sizes = [2, 6, 32], strides = [1, 1, 1]} : vector<2x6x64xf32> to vector<2x6x32xf32>
    %28 = vector.broadcast %26 : vector<1x6x32xf32> to vector<2x6x32xf32>
    %29 = arith.mulf %28, %27 : vector<2x6x32xf32>
    %30 = vector.shape_cast %17 : vector<6x6xf32> to vector<1x6x6xf32>
    %31 = vector.broadcast %30 : vector<1x6x6xf32> to vector<2x6x6xf32>
    %32 = arith.addf %4, %31 : vector<2x6x6xf32>
    %33 = vector.broadcast %18 : vector<1x6xf32> to vector<2x6xf32>
    %34 = arith.addf %13, %33 : vector<2x6xf32>
    %35 = vector.shape_cast %34 : vector<2x6xf32> to vector<2x6x1xf32>
    "tpu.trace_start"() <{level = 10 : i32, message = "bij,bje->bie"}> : () -> ()
    %cst_15 = arith.constant dense<0.000000e+00> : vector<2x6x32xf32>
    %36 = tpu.matmul %32, %25, %cst_15 {dimension_numbers = #tpu.dot_dimension_numbers<[2], [1], [1], [2], [0, 0, 0, 1, 1, 2], [0], [0]>} : vector<2x6x6xf32>, vector<2x6x32xf32>, vector<2x6x32xf32> -> vector<2x6x32xf32>
    "tpu.trace_stop"() : () -> ()
    %37 = vector.broadcast %35 : vector<2x6x1xf32> to vector<2x6x32xf32>
    %38 = arith.mulf %37, %29 : vector<2x6x32xf32>
    %39 = arith.addf %36, %38 : vector<2x6x32xf32>
    %cst_16 = arith.constant dense<0.000000e+00> : vector<32xf32>
    %40 = vector.multi_reduction <add>, %39, %cst_16 [0, 1] : vector<2x6x32xf32> to vector<32xf32>
    %41 = vector.shape_cast %40 : vector<32xf32> to vector<1x1x32xf32>
    %cst_17 = arith.constant 0.0833333358 : f32
    %42 = vector.broadcast %cst_17 : f32 to vector<1x1x32xf32>
    %43 = arith.mulf %41, %42 : vector<1x1x32xf32>
    %44 = arith.mulf %39, %39 : vector<2x6x32xf32>
    %cst_18 = arith.constant dense<0.000000e+00> : vector<32xf32>
    %45 = vector.multi_reduction <add>, %44, %cst_18 [0, 1] : vector<2x6x32xf32> to vector<32xf32>
    %46 = vector.shape_cast %45 : vector<32xf32> to vector<1x1x32xf32>
    %cst_19 = arith.constant 0.0833333358 : f32
    %47 = vector.broadcast %cst_19 : f32 to vector<1x1x32xf32>
    %48 = arith.mulf %46, %47 : vector<1x1x32xf32>
    %49 = arith.mulf %43, %43 : vector<1x1x32xf32>
    %50 = arith.subf %48, %49 : vector<1x1x32xf32>
    %51 = vector.broadcast %43 : vector<1x1x32xf32> to vector<2x6x32xf32>
    %52 = arith.subf %39, %51 : vector<2x6x32xf32>
    %cst_20 = arith.constant 9.99999974E-6 : f32
    %53 = vector.broadcast %cst_20 : f32 to vector<1x1x32xf32>
    %54 = arith.addf %50, %53 : vector<1x1x32xf32>
    %55 = math.rsqrt %54 : vector<1x1x32xf32>
    %56 = vector.broadcast %55 : vector<1x1x32xf32> to vector<2x6x32xf32>
    %57 = arith.mulf %52, %56 : vector<2x6x32xf32>
    %cst_21 = arith.constant 0.000000e+00 : f32
    %58 = vector.broadcast %cst_21 : f32 to vector<2x6x32xf32>
    %59 = arith.maximumf %57, %58 : vector<2x6x32xf32>
    %c0_22 = arith.constant 0 : index
    %c0_23 = arith.constant 0 : index
    %60 = vector.load %arg6[%c0_22, %c0_23] : memref<32x64xf32, #tpu.memory_space<vmem>>, vector<32x64xf32>
    %c0_24 = arith.constant 0 : index
    %c0_25 = arith.constant 0 : index
    %61 = vector.load %arg7[%c0_24, %c0_25] : memref<6x32xf32, #tpu.memory_space<vmem>>, vector<6x32xf32>
    %c0_26 = arith.constant 0 : index
    %c0_27 = arith.constant 0 : index
    %62 = vector.load %arg8[%c0_26, %c0_27] : memref<6x6xf32, #tpu.memory_space<vmem>>, vector<6x6xf32>
    %c0_28 = arith.constant 0 : index
    %c0_29 = arith.constant 0 : index
    %63 = vector.load %arg9[%c0_28, %c0_29] : memref<1x6xf32, #tpu.memory_space<vmem>>, vector<1x6xf32>
    %64 = vector.shape_cast %59 : vector<2x6x32xf32> to vector<12x32xf32>
    %cst_30 = arith.constant dense<0.000000e+00> : vector<12x64xf32>
    %65 = tpu.matmul %64, %60, %cst_30 {dimension_numbers = #tpu.dot_dimension_numbers<[1], [0], [0], [1], [0, 0, 1, 1], [], []>} : vector<12x32xf32>, vector<32x64xf32>, vector<12x64xf32> -> vector<12x64xf32>
    %66 = vector.shape_cast %65 : vector<12x64xf32> to vector<2x6x64xf32>
    %67 = vector.shape_cast %61 : vector<6x32xf32> to vector<1x6x32xf32>
    %68 = vector.extract_strided_slice %66 {offsets = [0, 0, 0], sizes = [2, 6, 32], strides = [1, 1, 1]} : vector<2x6x64xf32> to vector<2x6x32xf32>
    %69 = vector.broadcast %67 : vector<1x6x32xf32> to vector<2x6x32xf32>
    %70 = arith.mulf %69, %68 : vector<2x6x32xf32>
    %71 = vector.shape_cast %61 : vector<6x32xf32> to vector<1x6x32xf32>
    %72 = vector.extract_strided_slice %66 {offsets = [0, 0, 32], sizes = [2, 6, 32], strides = [1, 1, 1]} : vector<2x6x64xf32> to vector<2x6x32xf32>
    %73 = vector.broadcast %71 : vector<1x6x32xf32> to vector<2x6x32xf32>
    %74 = arith.mulf %73, %72 : vector<2x6x32xf32>
    %75 = vector.shape_cast %62 : vector<6x6xf32> to vector<1x6x6xf32>
    %76 = vector.broadcast %75 : vector<1x6x6xf32> to vector<2x6x6xf32>
    %77 = arith.addf %4, %76 : vector<2x6x6xf32>
    %78 = vector.broadcast %63 : vector<1x6xf32> to vector<2x6xf32>
    %79 = arith.addf %13, %78 : vector<2x6xf32>
    %80 = vector.shape_cast %79 : vector<2x6xf32> to vector<2x6x1xf32>
    "tpu.trace_start"() <{level = 10 : i32, message = "bij,bje->bie"}> : () -> ()
    %cst_31 = arith.constant dense<0.000000e+00> : vector<2x6x32xf32>
    %81 = tpu.matmul %77, %70, %cst_31 {dimension_numbers = #tpu.dot_dimension_numbers<[2], [1], [1], [2], [0, 0, 0, 1, 1, 2], [0], [0]>} : vector<2x6x6xf32>, vector<2x6x32xf32>, vector<2x6x32xf32> -> vector<2x6x32xf32>
    "tpu.trace_stop"() : () -> ()
    %82 = vector.broadcast %80 : vector<2x6x1xf32> to vector<2x6x32xf32>
    %83 = arith.mulf %82, %74 : vector<2x6x32xf32>
    %84 = arith.addf %81, %83 : vector<2x6x32xf32>
    %cst_32 = arith.constant dense<0.000000e+00> : vector<32xf32>
    %85 = vector.multi_reduction <add>, %84, %cst_32 [0, 1] : vector<2x6x32xf32> to vector<32xf32>
    %86 = vector.shape_cast %85 : vector<32xf32> to vector<1x1x32xf32>
    %cst_33 = arith.constant 0.0833333358 : f32
    %87 = vector.broadcast %cst_33 : f32 to vector<1x1x32xf32>
    %88 = arith.mulf %86, %87 : vector<1x1x32xf32>
    %89 = arith.mulf %84, %84 : vector<2x6x32xf32>
    %cst_34 = arith.constant dense<0.000000e+00> : vector<32xf32>
    %90 = vector.multi_reduction <add>, %89, %cst_34 [0, 1] : vector<2x6x32xf32> to vector<32xf32>
    %91 = vector.shape_cast %90 : vector<32xf32> to vector<1x1x32xf32>
    %cst_35 = arith.constant 0.0833333358 : f32
    %92 = vector.broadcast %cst_35 : f32 to vector<1x1x32xf32>
    %93 = arith.mulf %91, %92 : vector<1x1x32xf32>
    %94 = arith.mulf %88, %88 : vector<1x1x32xf32>
    %95 = arith.subf %93, %94 : vector<1x1x32xf32>
    %96 = vector.broadcast %88 : vector<1x1x32xf32> to vector<2x6x32xf32>
    %97 = arith.subf %84, %96 : vector<2x6x32xf32>
    %cst_36 = arith.constant 9.99999974E-6 : f32
    %98 = vector.broadcast %cst_36 : f32 to vector<1x1x32xf32>
    %99 = arith.addf %95, %98 : vector<1x1x32xf32>
    %100 = math.rsqrt %99 : vector<1x1x32xf32>
    %101 = vector.broadcast %100 : vector<1x1x32xf32> to vector<2x6x32xf32>
    %102 = arith.mulf %97, %101 : vector<2x6x32xf32>
    %cst_37 = arith.constant 0.000000e+00 : f32
    %103 = vector.broadcast %cst_37 : f32 to vector<2x6x32xf32>
    %104 = arith.maximumf %102, %103 : vector<2x6x32xf32>
    %c0_38 = arith.constant 0 : index
    %c0_39 = arith.constant 0 : index
    %105 = vector.load %arg10[%c0_38, %c0_39] : memref<32x64xf32, #tpu.memory_space<vmem>>, vector<32x64xf32>
    %c0_40 = arith.constant 0 : index
    %c0_41 = arith.constant 0 : index
    %106 = vector.load %arg11[%c0_40, %c0_41] : memref<6x32xf32, #tpu.memory_space<vmem>>, vector<6x32xf32>
    %c0_42 = arith.constant 0 : index
    %c0_43 = arith.constant 0 : index
    %107 = vector.load %arg12[%c0_42, %c0_43] : memref<6x6xf32, #tpu.memory_space<vmem>>, vector<6x6xf32>
    %c0_44 = arith.constant 0 : index
    %c0_45 = arith.constant 0 : index
    %108 = vector.load %arg13[%c0_44, %c0_45] : memref<1x6xf32, #tpu.memory_space<vmem>>, vector<1x6xf32>
    %109 = vector.shape_cast %104 : vector<2x6x32xf32> to vector<12x32xf32>
    %cst_46 = arith.constant dense<0.000000e+00> : vector<12x64xf32>
    %110 = tpu.matmul %109, %105, %cst_46 {dimension_numbers = #tpu.dot_dimension_numbers<[1], [0], [0], [1], [0, 0, 1, 1], [], []>} : vector<12x32xf32>, vector<32x64xf32>, vector<12x64xf32> -> vector<12x64xf32>
    %111 = vector.shape_cast %110 : vector<12x64xf32> to vector<2x6x64xf32>
    %112 = vector.shape_cast %106 : vector<6x32xf32> to vector<1x6x32xf32>
    %113 = vector.extract_strided_slice %111 {offsets = [0, 0, 0], sizes = [2, 6, 32], strides = [1, 1, 1]} : vector<2x6x64xf32> to vector<2x6x32xf32>
    %114 = vector.broadcast %112 : vector<1x6x32xf32> to vector<2x6x32xf32>
    %115 = arith.mulf %114, %113 : vector<2x6x32xf32>
    %116 = vector.shape_cast %106 : vector<6x32xf32> to vector<1x6x32xf32>
    %117 = vector.extract_strided_slice %111 {offsets = [0, 0, 32], sizes = [2, 6, 32], strides = [1, 1, 1]} : vector<2x6x64xf32> to vector<2x6x32xf32>
    %118 = vector.broadcast %116 : vector<1x6x32xf32> to vector<2x6x32xf32>
    %119 = arith.mulf %118, %117 : vector<2x6x32xf32>
    %120 = vector.shape_cast %107 : vector<6x6xf32> to vector<1x6x6xf32>
    %121 = vector.broadcast %120 : vector<1x6x6xf32> to vector<2x6x6xf32>
    %122 = arith.addf %4, %121 : vector<2x6x6xf32>
    %123 = vector.broadcast %108 : vector<1x6xf32> to vector<2x6xf32>
    %124 = arith.addf %13, %123 : vector<2x6xf32>
    %125 = vector.shape_cast %124 : vector<2x6xf32> to vector<2x6x1xf32>
    "tpu.trace_start"() <{level = 10 : i32, message = "bij,bje->bie"}> : () -> ()
    %cst_47 = arith.constant dense<0.000000e+00> : vector<2x6x32xf32>
    %126 = tpu.matmul %122, %115, %cst_47 {dimension_numbers = #tpu.dot_dimension_numbers<[2], [1], [1], [2], [0, 0, 0, 1, 1, 2], [0], [0]>} : vector<2x6x6xf32>, vector<2x6x32xf32>, vector<2x6x32xf32> -> vector<2x6x32xf32>
    "tpu.trace_stop"() : () -> ()
    %127 = vector.broadcast %125 : vector<2x6x1xf32> to vector<2x6x32xf32>
    %128 = arith.mulf %127, %119 : vector<2x6x32xf32>
    %129 = arith.addf %126, %128 : vector<2x6x32xf32>
    %cst_48 = arith.constant dense<0.000000e+00> : vector<32xf32>
    %130 = vector.multi_reduction <add>, %129, %cst_48 [0, 1] : vector<2x6x32xf32> to vector<32xf32>
    %131 = vector.shape_cast %130 : vector<32xf32> to vector<1x1x32xf32>
    %cst_49 = arith.constant 0.0833333358 : f32
    %132 = vector.broadcast %cst_49 : f32 to vector<1x1x32xf32>
    %133 = arith.mulf %131, %132 : vector<1x1x32xf32>
    %134 = arith.mulf %129, %129 : vector<2x6x32xf32>
    %cst_50 = arith.constant dense<0.000000e+00> : vector<32xf32>
    %135 = vector.multi_reduction <add>, %134, %cst_50 [0, 1] : vector<2x6x32xf32> to vector<32xf32>
    %136 = vector.shape_cast %135 : vector<32xf32> to vector<1x1x32xf32>
    %cst_51 = arith.constant 0.0833333358 : f32
    %137 = vector.broadcast %cst_51 : f32 to vector<1x1x32xf32>
    %138 = arith.mulf %136, %137 : vector<1x1x32xf32>
    %139 = arith.mulf %133, %133 : vector<1x1x32xf32>
    %140 = arith.subf %138, %139 : vector<1x1x32xf32>
    %141 = vector.broadcast %133 : vector<1x1x32xf32> to vector<2x6x32xf32>
    %142 = arith.subf %129, %141 : vector<2x6x32xf32>
    %cst_52 = arith.constant 9.99999974E-6 : f32
    %143 = vector.broadcast %cst_52 : f32 to vector<1x1x32xf32>
    %144 = arith.addf %140, %143 : vector<1x1x32xf32>
    %145 = math.rsqrt %144 : vector<1x1x32xf32>
    %146 = vector.broadcast %145 : vector<1x1x32xf32> to vector<2x6x32xf32>
    %147 = arith.mulf %142, %146 : vector<2x6x32xf32>
    %cst_53 = arith.constant 0.000000e+00 : f32
    %148 = vector.broadcast %cst_53 : f32 to vector<2x6x32xf32>
    %149 = arith.maximumf %147, %148 : vector<2x6x32xf32>
    %150 = arith.addf %59, %149 : vector<2x6x32xf32>
    %c0_54 = arith.constant 0 : index
    %c0_55 = arith.constant 0 : index
    %151 = vector.load %arg14[%c0_54, %c0_55] : memref<32x16xf32, #tpu.memory_space<vmem>>, vector<32x16xf32>
    %c0_56 = arith.constant 0 : index
    %c0_57 = arith.constant 0 : index
    %152 = vector.load %arg15[%c0_56, %c0_57] : memref<6x8xf32, #tpu.memory_space<vmem>>, vector<6x8xf32>
    %c0_58 = arith.constant 0 : index
    %c0_59 = arith.constant 0 : index
    %153 = vector.load %arg16[%c0_58, %c0_59] : memref<6x6xf32, #tpu.memory_space<vmem>>, vector<6x6xf32>
    %c0_60 = arith.constant 0 : index
    %c0_61 = arith.constant 0 : index
    %154 = vector.load %arg17[%c0_60, %c0_61] : memref<1x6xf32, #tpu.memory_space<vmem>>, vector<1x6xf32>
    %155 = vector.shape_cast %150 : vector<2x6x32xf32> to vector<12x32xf32>
    %cst_62 = arith.constant dense<0.000000e+00> : vector<12x16xf32>
    %156 = tpu.matmul %155, %151, %cst_62 {dimension_numbers = #tpu.dot_dimension_numbers<[1], [0], [0], [1], [0, 0, 1, 1], [], []>} : vector<12x32xf32>, vector<32x16xf32>, vector<12x16xf32> -> vector<12x16xf32>
    %157 = vector.shape_cast %156 : vector<12x16xf32> to vector<2x6x16xf32>
    %158 = vector.shape_cast %152 : vector<6x8xf32> to vector<1x6x8xf32>
    %159 = vector.extract_strided_slice %157 {offsets = [0, 0, 0], sizes = [2, 6, 8], strides = [1, 1, 1]} : vector<2x6x16xf32> to vector<2x6x8xf32>
    %160 = vector.broadcast %158 : vector<1x6x8xf32> to vector<2x6x8xf32>
    %161 = arith.mulf %160, %159 : vector<2x6x8xf32>
    %162 = vector.shape_cast %152 : vector<6x8xf32> to vector<1x6x8xf32>
    %163 = vector.extract_strided_slice %157 {offsets = [0, 0, 8], sizes = [2, 6, 8], strides = [1, 1, 1]} : vector<2x6x16xf32> to vector<2x6x8xf32>
    %164 = vector.broadcast %162 : vector<1x6x8xf32> to vector<2x6x8xf32>
    %165 = arith.mulf %164, %163 : vector<2x6x8xf32>
    %166 = vector.shape_cast %153 : vector<6x6xf32> to vector<1x6x6xf32>
    %167 = vector.broadcast %166 : vector<1x6x6xf32> to vector<2x6x6xf32>
    %168 = arith.addf %4, %167 : vector<2x6x6xf32>
    %169 = vector.broadcast %154 : vector<1x6xf32> to vector<2x6xf32>
    %170 = arith.addf %13, %169 : vector<2x6xf32>
    %171 = vector.shape_cast %170 : vector<2x6xf32> to vector<2x6x1xf32>
    "tpu.trace_start"() <{level = 10 : i32, message = "bij,bje->bie"}> : () -> ()
    %cst_63 = arith.constant dense<0.000000e+00> : vector<2x6x8xf32>
    %172 = tpu.matmul %168, %161, %cst_63 {dimension_numbers = #tpu.dot_dimension_numbers<[2], [1], [1], [2], [0, 0, 0, 1, 1, 2], [0], [0]>} : vector<2x6x6xf32>, vector<2x6x8xf32>, vector<2x6x8xf32> -> vector<2x6x8xf32>
    "tpu.trace_stop"() : () -> ()
    %173 = vector.broadcast %171 : vector<2x6x1xf32> to vector<2x6x8xf32>
    %174 = arith.mulf %173, %165 : vector<2x6x8xf32>
    %175 = arith.addf %172, %174 : vector<2x6x8xf32>
    %cst_64 = arith.constant dense<0.000000e+00> : vector<8xf32>
    %176 = vector.multi_reduction <add>, %175, %cst_64 [0, 1] : vector<2x6x8xf32> to vector<8xf32>
    %177 = vector.shape_cast %176 : vector<8xf32> to vector<1x1x8xf32>
    %cst_65 = arith.constant 0.0833333358 : f32
    %178 = vector.broadcast %cst_65 : f32 to vector<1x1x8xf32>
    %179 = arith.mulf %177, %178 : vector<1x1x8xf32>
    %180 = arith.mulf %175, %175 : vector<2x6x8xf32>
    %cst_66 = arith.constant dense<0.000000e+00> : vector<8xf32>
    %181 = vector.multi_reduction <add>, %180, %cst_66 [0, 1] : vector<2x6x8xf32> to vector<8xf32>
    %182 = vector.shape_cast %181 : vector<8xf32> to vector<1x1x8xf32>
    %cst_67 = arith.constant 0.0833333358 : f32
    %183 = vector.broadcast %cst_67 : f32 to vector<1x1x8xf32>
    %184 = arith.mulf %182, %183 : vector<1x1x8xf32>
    %185 = arith.mulf %179, %179 : vector<1x1x8xf32>
    %186 = arith.subf %184, %185 : vector<1x1x8xf32>
    %187 = vector.broadcast %179 : vector<1x1x8xf32> to vector<2x6x8xf32>
    %188 = arith.subf %175, %187 : vector<2x6x8xf32>
    %cst_68 = arith.constant 9.99999974E-6 : f32
    %189 = vector.broadcast %cst_68 : f32 to vector<1x1x8xf32>
    %190 = arith.addf %186, %189 : vector<1x1x8xf32>
    %191 = math.rsqrt %190 : vector<1x1x8xf32>
    %192 = vector.broadcast %191 : vector<1x1x8xf32> to vector<2x6x8xf32>
    %193 = arith.mulf %188, %192 : vector<2x6x8xf32>
    %cst_69 = arith.constant 0.000000e+00 : f32
    %194 = vector.broadcast %cst_69 : f32 to vector<2x6x8xf32>
    %195 = arith.maximumf %193, %194 : vector<2x6x8xf32>
    %c0_70 = arith.constant 0 : index
    %c0_71 = arith.constant 0 : index
    %c0_72 = arith.constant 0 : index
    %196 = vector.load %arg18[%c0_70, %c0_71, %c0_72] : memref<2x6x8xf32, #tpu.memory_space<vmem>>, vector<2x6x8xf32>
    tpu.vector_store %arg18[%c0_70, %c0_71, %c0_72], %195 {strides = array<i32>} : memref<2x6x8xf32, #tpu.memory_space<vmem>>, vector<2x6x8xf32>,
    return
  }
}

</mosaic_0001>

<bundles_post_ra>
// kernel: res_graph_encoder.1
= control target key start
LH: loop header
LB: loop body
LE: loop exit
PB: predicated region body
PF: predicated region fallthrough
CT: control target
= control target key end

     0   :  { %v129_v0 = vlaneseq  ;;  %v2052_v4 = vmov 1983009808   ;;  %v2053_v6 = vmov 0.0   ;;  %vm138_vm1 = vcmask 46080   ;;  %s2056_s19 = smov 96   ;;  %s2057_s28 = smov 120   ;;  %s2417_s2 = inlined_call_operand.vmem [shape: f32[16,64], index: 2, kind: input, shape index: {}]   ;;  %s2418_s0 = inlined_call_operand.vmem [shape: f32[2,6,16], index: 0, kind: input, shape index: {}]   ;;  %s2419_s1 = inlined_call_operand.vmem [shape: f32[2,6,6], index: 1, kind: input, shape index: {}]   ;;  %s2420_s5 = inlined_call_operand.vmem [shape: f32[1,6], index: 5, kind: input, shape index: {}]   ;;  %s2421_s4 = inlined_call_operand.vmem [shape: f32[6,6], index: 4, kind: input, shape index: {}]   ;;  %s2422_s3 = inlined_call_operand.vmem [shape: f32[6,32], index: 3, kind: input, shape index: {}]   ;;  %s2423_s9 = inlined_call_operand.vmem [shape: f32[1,6], index: 9, kind: input, shape index: {}]   ;;  %s2424_s6 = inlined_call_operand.vmem [shape: f32[32,64], index: 6, kind: input, shape index: {}]   ;;  %s2425_s7 = inlined_call_operand.vmem [shape: f32[6,32], index: 7, kind: input, shape index: {}]   ;;  %s2426_s8 = inlined_call_operand.vmem [shape: f32[6,6], index: 8, kind: input, shape index: {}]   ;;  %s2427_s13 = inlined_call_operand.vmem [shape: f32[1,6], index: 13, kind: input, shape index: {}]   ;;  %s2428_s17 = inlined_call_operand.vmem [shape: f32[1,6], index: 17, kind: input, shape index: {}]   ;;  %s2429_s10 = inlined_call_operand.vmem [shape: f32[32,64], index: 10, kind: input, shape index: {}]   ;;  %s2430_s11 = inlined_call_operand.vmem [shape: f32[6,32], index: 11, kind: input, shape index: {}]   ;;  %s2431_s12 = inlined_call_operand.vmem [shape: f32[6,6], index: 12, kind: input, shape index: {}]   ;;  %s2432_s14 = inlined_call_operand.vmem [shape: f32[32,16], index: 14, kind: input, shape index: {}]   ;;  %s2433_s15 = inlined_call_operand.vmem [shape: f32[6,8], index: 15, kind: input, shape index: {}]   ;;  %s2434_s16 = inlined_call_operand.vmem [shape: f32[6,6], index: 16, kind: input, shape index: {}]   ;;  %s2435_s18 = inlined_call_operand.vmem [shape: f32[2,6,8], index: 18, kind: output, shape index: {}]  }
   0x1   :  { %2439 = sst [smem:[#allocation2_spill]] %s2417_s2  ;;  %v156_v5 = vunpack.c.l.s4 %v2052_v4  ;;  %1933 = vmatprep.subr.mxu1 %v2053_v6  ;;  %vm211_vm2 = vcmask 130048   ;;  %v2054_v35 = vmov 0   ;;  %v1862_v36 = vld [vmem:[%s2420_s5] ss:$0 sm:$0xff]  ;;  %vm2055_vm3 = vmmov 0  }
   0x2   :  { %2440 = sst [smem:[#allocation3_spill]] %s2418_s0  ;;  %s2442_s29 = sld [smem:[#allocation2_spill]]  ;;  %v130_v8 = vshrl.u32 %v129_v0, 7  ;;  %v132_v11 = vand.u32 127, %v129_v0  ;;  %2040 = vset.pattern.permute.xlu1 %v2054_v35  ;;  %1935 = vmatprep.mubr.msk.f32.mxu1 %vm2055_vm3, %v2053_v6  ;;  %v150_v60 = vld [vmem:[%s2421_s4] sm:$0x3f] }
   0x3   :  { %2441 = sst [smem:[#allocation4_spill]] %s2419_s1  ;;  %s2443_s20 = sld [smem:[#allocation3_spill]]  ;;  %v157_v13 = vunpack.c.0.s8 %v156_v5  ;;  %v149_v61 = vld [vmem:[%s2422_s3] sm:$0x3f]  ;;  %vm391_vm4 = vcmask 1045504   ;;  %vm387_vm5 = vcmask 48128  }
   0x4   :  { %s2444_s24 = sld [smem:[#allocation4_spill]]  ;;  %vm133_vm0 = vcmp.eq.s32.totalorder %v130_v8, %v132_v11  ;;  %vm541_vm6 = vcmask 259072   ;;  %vm640_vm7 = vcmask 261120   ;;  %vm1820_vm8 = vcmask 62464  }
   0x5   :  { %v2172_v16 = vsub.s32 %v157_v13, %v130_v8  ;;  %v1859_v17 = vsel %vm133_vm0, 1.0, %v2053_v6  ;;  %v1869_v8 = vld [vmem:[%s2423_s9] ss:$0 sm:$0xff] }
   0x8   :  { %v147_v1 = vld [vmem:[%s2442_s29] sm:$0xff]  ;;  %v148_v2 = vld [vmem:[%s2442_s29 + $0x8] sm:$0xff] }
   0x9   :  { %v145_v3 = vld [vmem:[%s2443_s20] sm:$0x3f]  ;;  %v2006_v7 = vpack.c.bf16 %v148_v2, %v147_v1  ;;  %v146_v9 = vld [vmem:[%s2443_s20 + $0x8] sm:$0x3f] }
   0xa   :  { %v59_v10 = vld [vmem:[%s2444_s24] sm:$0x3f]  ;;  %v154_v12 = vcombine.high %v145_v3, %v145_v3  ;;  %v170_v14 = vcombine.high %v146_v9, %v146_v9  ;;  %v60_v15 = vld [vmem:[%s2444_s24 + $0x8] sm:$0x3f]  ;;  %v161_v20 = vrot.slane %v145_v3, %v2172_v16  ;;  %v177_v22 = vrot.slane %v146_v9, %v2172_v16 }
   0xb   :  { %61 = vxpose.xlu0.b32.start.end [1/1] (short) (narrow) %v59_v10, 8  ;;  %2007 = vmatprep.subr.bf16.mxu0 %v2006_v7  ;;  %v136_v18 = vmul.f32 %v1859_v17, %v59_v10  ;;  %v137_v19 = vmul.f32 %v1859_v17, %v60_v15 }
   0xc   :  { %2009 = vmatpush3.bf16.msra.mxu0 %v2006_v7  ;;  %v168_v21 = vrot.slane %v154_v12, %v2172_v16  ;;  %v184_v23 = vrot.slane %v170_v14, %v2172_v16  ;;  %v169_v25 = vcombine.high %v161_v20, %v161_v20  ;;  %v185_v26 = vcombine.high %v177_v22, %v177_v22 }
   0xd   :  { %v139_v24 = vsel %vm138_vm1, %v136_v18, 0.0  ;;  %v142_v28 = vsel %vm138_vm1, %v137_v19, 0.0 }
   0xe   :  { %v187_v27 = vcombine.low %v168_v21, %v177_v22  ;;  %140 = vadd.xlane.f32.xlu1 %v139_v24  ;;  %v186_v29 = vcombine.low %v161_v20, %v169_v25  ;;  %v203_v31 = vcombine.low %v185_v26, %v184_v23  ;;  %v574_v21 = vld [vmem:[%s2424_s6] sm:$0xff]  ;;  %v575_v22 = vld [vmem:[%s2424_s6 + $0x8] sm:$0xff]  ;;  %v576_v24 = vld [vmem:[%s2424_s6 + $0x10] sm:$0xff] }
   0xf   :  { %93 = vxpose.xlu0.b32.start.end [1/1] (short) (narrow) %v60_v15, 8  ;;  %v2010_v23 = vpack.c.bf16 %v575_v22, %v574_v21  ;;  %v577_v25 = vld [vmem:[%s2424_s6 + $0x18] sm:$0xff] }
  0x10   :  { %v201_v30 = vrot.slane %v187_v27, %v2172_v16  ;;  %v194_v32 = vrot.slane %v186_v29, %v2172_v16  ;;  %v210_v33 = vrot.slane %v203_v31, %v2172_v16  ;;  %v2014_v26 = vpack.c.bf16 %v577_v25, %v576_v24 }
  0x11   :  { %2011 = vmatprep.subr.bf16.mxu0 %v2010_v23 }
  0x12   :  { %143 = vadd.xlane.f32.xlu1 %v142_v28  ;;  %v202_v34 = vcombine.low %v194_v32, %v201_v30 }
  0x14   :  { %1930 = vmatprep.mubr.msk.f32.mxu0 %vm211_vm2, %v202_v34 }
  0x15   :  { %1931 = vmatmul.mubr.msk.f32.vlgmr.msra.gmra.mrb[0].mxu0 %vm211_vm2, %v210_v33 }
  0x16   :  { %2013 = vmatpush3.bf16.msra.mxu0 %v2010_v23 }
  0x17   :  { %2015 = vmatprep.subr.bf16.mxu0 %v2014_v26 }
  0x1a   :  { %2017 = vmatpush3.bf16.msra.mxu0 %v2014_v26 }
  0x38   :  { %370 = vbcast.lane.b32.xlu0 %v1862_v36, 256 }
  0x39   :  { %2041 = vset.pattern.permute.xlu0 %v2054_v35 }
  0x8b   :  { %v77_v37 = vpop.trf.xlu0 }
  0x8c   :  { %v125_v49 = vadd.f32 %v77_v37, %v59_v10 }
  0x8e   :  { %v2196_v55 = vmul.f32 0.5, %v125_v49 }
  0x8f   :  { %v109_v38 = vpop.trf.xlu0 }
  0x90   :  { %v126_v56 = vadd.f32 %v109_v38, %v60_v15  ;;  %v362_v2 = vadd.f32 %v150_v60, %v2196_v55 }
  0x92   :  { %v2208_v1 = vmul.f32 0.5, %v126_v56 }
  0x94   :  { %v363_v7 = vadd.f32 %v150_v60, %v2208_v1 }
  0x9b   :  { %v2187_v39 = vpop.xlane.xlu1 %140 }
  0x9f   :  { %v2189_v41 = vpop.xlane.xlu1 %143 }
  0xaa   :  { %v371_v40 = vpop.permute.xlu0 %370 }
  0xab   :  { %v373_v42 = vadd.f32 %v371_v40, %v2187_v39  ;;  %v374_v43 = vadd.f32 %v371_v40, %v2189_v41 }
  0xad   :  { %377 = vperm.xlu1 %2040, %v373_v42  }
  0xb1   :  { %382 = vperm.xlu1 %2040, %v374_v43  }
  0xe8   :  { %v1932_v44 = vpop.f32.mrb[0].mxu0 }
  0xe9   :  { %v282_v45 = vpop.f32.mrb[1].mxu0  ;;  %v316_v46 = vrot.slane %v1932_v44, %v2172_v16 }
  0xea   :  { %v293_v47 = vcombine.high %v282_v45, %v282_v45  ;;  %v300_v48 = vrot.slane %v282_v45, %v2172_v16 }
  0xeb   :  { %v317_v52 = vcombine.high %v316_v46, %v316_v46 }
  0xec   :  { %v307_v50 = vrot.slane %v293_v47, %v2172_v16  ;;  %v308_v51 = vcombine.high %v300_v48, %v300_v48 }
  0xed   :  { %v348_v62 = vrot.slane %v317_v52, %v2172_v16 }
  0xee   :  { %v309_v53 = vcombine.high %v307_v50, %v307_v50  ;;  %v318_v54 = vcombine.low %v300_v48, %v308_v51  ;;  %v332_v58 = vrot.slane %v307_v50, %v2172_v16 }
  0xf0   :  { %v325_v57 = vrot.slane %v318_v54, %v2172_v16  ;;  %v334_v59 = vcombine.low %v309_v53, %v316_v46 }
  0xf2   :  { %v333_v63 = vcombine.low %v325_v57, %v332_v58  ;;  %v341_v0 = vrot.slane %v334_v59, %v2172_v16 }
  0xf4   :  { %354 = vrot.lane.b32.xlu1 %v333_v63, %s2056_s19  ;;  %v352_v3 = vmul.f32 %v333_v63, %v149_v61  ;;  %v349_v4 = vcombine.low %v341_v0, %v348_v62 }
  0xf6   :  { %1934 = vmatpush3.msk.msra.mxu1 %vm391_vm4, %v352_v3  ;;  %v353_v5 = vmul.f32 %v349_v4, %v149_v61 }
  0xf7   :  { %1936 = vmatmul.mubr.msk.f32.vlgmr.msra.gmra.mrb[0].mxu1 %vm387_vm5, %v362_v2  ;;  %1938 = vmatprep.subr.mxu1 %v2053_v6 }
  0xf8   :  { %356 = vrot.lane.b32.xlu1 %v349_v4, %s2056_s19  ;;  %1939 = vmatpush3.msk.msra.mxu1 %vm391_vm4, %v353_v5 }
  0xf9   :  { %1940 = vmatprep.mubr.msk.f32.mxu1 %vm2055_vm3, %v2053_v6  ;;  %1954 = vmatprep.subr.mxu1 %v2053_v6 }
  0xfb   :  { %1941 = vmatmul.mubr.msk.f32.vlgmr.msra.gmra.mrb[2].mxu1 %vm387_vm5, %v363_v7 }
  0xfc   :  { %799 = vbcast.lane.b32.xlu1 %v1869_v8, 256  ;;  %1956 = vmatprep.mubr.msk.f32.mxu1 %vm2055_vm3, %v2053_v6 }
 0x12c   :  { %v378_v9 = vpop.permute.xlu1 %377 }
 0x130   :  { %v383_v10 = vpop.permute.xlu1 %382 }
 0x166   :  { %v355_v11 = vpop.permute.xlu1 %354 }
 0x167   :  { %v360_v12 = vmul.f32 %v355_v11, %v149_v61 }
 0x169   :  { %v385_v13 = vmul.f32 %v378_v9, %v360_v12 }
 0x16a   :  { %v357_v14 = vpop.permute.xlu1 %356 }
 0x16b   :  { %v361_v15 = vmul.f32 %v357_v14, %v149_v61 }
 0x16d   :  { %v386_v17 = vmul.f32 %v383_v10, %v361_v15 }
 0x16e   :  { %v800_v18 = vpop.permute.xlu1 %799 }
 0x16f   :  { %v802_v19 = vadd.f32 %v800_v18, %v2187_v39  ;;  %v803_v20 = vadd.f32 %v800_v18, %v2189_v41 }
 0x171   :  { %806 = vperm.xlu1 %2040, %v802_v19  }
 0x175   :  { %811 = vperm.xlu1 %2040, %v803_v20  }
 0x1ca   :  { %v461_v27 = vpop.f32.mrb[0].mxu1 }
 0x1cb   :  { %v462_v28 = vadd.f32 %v461_v27, %v385_v13  ;;  %v1937_v29 = vpop.f32.mrb[1].mxu1 }
 0x1cd   :  { %v552_v31 = vmul.f32 %v462_v28, %v462_v28  ;;  %v542_v34 = vsel %vm541_vm6, %v462_v28, 0.0 }
 0x1ce   :  { %v537_v30 = vpop.f32.mrb[2].mxu1 }
 0x1cf   :  { %v538_v32 = vadd.f32 %v537_v30, %v386_v17  ;;  %v1942_v33 = vpop.f32.mrb[3].mxu1  ;;  %v554_v38 = vsel %vm541_vm6, %v552_v31, 0.0 }
 0x1d1   :  { %v543_v35 = vsel %vm541_vm6, %v538_v32, 0.0  ;;  %v553_v36 = vmul.f32 %v538_v32, %v538_v32 }
 0x1d2   :  { %v544_v37 = vadd.f32 %v543_v35, %v542_v34  ;;  %v578_v35 = vld [vmem:[%s2425_s7] sm:$0x3f] }
 0x1d3   :  { %v555_v40 = vsel %vm541_vm6, %v553_v36, 0.0  ;;  %v579_v36 = vld [vmem:[%s2426_s8] sm:$0x3f] }
 0x1d4   :  { %v545_v42 = vrot.slane %v544_v37, 4  ;;  %v556_v43 = vadd.f32 %v555_v40, %v554_v38 }
 0x1d6   :  { %v546_v44 = vadd.f32 %v545_v42, %v544_v37  ;;  %v557_v45 = vrot.slane %v556_v43, 4 }
 0x1d8   :  { %v547_v46 = vrot.slane %v546_v44, 2  ;;  %v558_v47 = vadd.f32 %v557_v45, %v556_v43  ;;  %v1876_v45 = vld [vmem:[%s2427_s13] ss:$0 sm:$0xff] }
 0x1da   :  { %v548_v48 = vadd.f32 %v547_v46, %v546_v44  ;;  %v559_v49 = vrot.slane %v558_v47, 2  ;;  %v791_v44 = vadd.f32 %v579_v36, %v2196_v55 }
 0x1dc   :  { %v549_v50 = vrot.slane %v548_v48, 1  ;;  %v560_v51 = vadd.f32 %v559_v49, %v558_v47  ;;  %v792_v47 = vadd.f32 %v579_v36, %v2208_v1 }
 0x1de   :  { %v550_v52 = vadd.f32 %v549_v50, %v548_v48  ;;  %v561_v53 = vrot.slane %v560_v51, 1 }
 0x1e0   :  { %v551_v54 = vmul.f32 0.083333336, %v550_v52  ;;  %v562_v56 = vadd.f32 %v561_v53, %v560_v51  ;;  %v1883_v52 = vld [vmem:[%s2428_s17] ss:$0 sm:$0xff] }
 0x1e1   :  { %v1000_v53 = vld [vmem:[%s2429_s10] sm:$0xff] }
 0x1e2   :  { %v563_v57 = vmul.f32 0.083333336, %v562_v56  ;;  %v564_v58 = vmul.f32 %v551_v54, %v551_v54  ;;  %v566_v59 = vsub.f32 %v462_v28, %v551_v54  ;;  %v567_v60 = vsub.f32 %v538_v32, %v551_v54  ;;  %v1001_v54 = vld [vmem:[%s2429_s10 + $0x8] sm:$0xff] }
 0x1e3   :  { %v2018_v56 = vpack.c.bf16 %v1001_v54, %v1000_v53 }
 0x1e4   :  { %v565_v61 = vsub.f32 %v563_v57, %v564_v58  ;;  %v1002_v57 = vld [vmem:[%s2429_s10 + $0x10] sm:$0xff]  ;;  %v1003_v58 = vld [vmem:[%s2429_s10 + $0x18] sm:$0xff] }
 0x1e5   :  { %2019 = vmatprep.subr.bf16.mxu0 %v2018_v56 }
 0x1e6   :  { %v568_v62 = vadd.f32 1e-05, %v565_v61 }
 0x1e8   :  { %2044 = vrsqrt.f32 %v568_v62 }
 0x1f2   :  { %v2045_v63 = vpop.eup %2044 }
 0x1f3   :  { %v570_v0 = vmul.f32 %v2045_v63, %v566_v59  ;;  %v571_v2 = vmul.f32 %v2045_v63, %v567_v60  ;;  %v2022_v59 = vpack.c.bf16 %v1003_v58, %v1002_v57  ;;  %v807_v60 = vpop.permute.xlu1 %806 }
 0x1f5   :  { %v2245_v3 = vmax.f32 %v570_v0, 0.0  ;;  %v2247_v4 = vmax.f32 %v571_v2, 0.0 }
 0x1f7   :  { %v599_v5 = vcombine.high %v2247_v4, %v2247_v4  ;;  %v606_v7 = vrot.slane %v2247_v4, %v2172_v16  ;;  %v583_v8 = vcombine.high %v2245_v3, %v2245_v3  ;;  %v590_v9 = vrot.slane %v2245_v3, %v2172_v16  ;;  %v812_v61 = vpop.permute.xlu1 %811 }
 0x1f9   :  { %v613_v10 = vrot.slane %v599_v5, %v2172_v16  ;;  %v614_v11 = vcombine.high %v606_v7, %v606_v7  ;;  %v597_v12 = vrot.slane %v583_v8, %v2172_v16  ;;  %v598_v13 = vcombine.high %v590_v9, %v590_v9 }
 0x1fb   :  { %v615_v14 = vcombine.low %v590_v9, %v598_v13  ;;  %v616_v15 = vcombine.low %v597_v12, %v606_v7  ;;  %v632_v17 = vcombine.low %v614_v11, %v613_v10 }
 0x1fd   :  { %v623_v18 = vrot.slane %v615_v14, %v2172_v16  ;;  %v630_v19 = vrot.slane %v616_v15, %v2172_v16  ;;  %v639_v21 = vrot.slane %v632_v17, %v2172_v16 }
 0x1ff   :  { %v631_v20 = vcombine.low %v623_v18, %v630_v19 }
 0x201   :  { %1951 = vmatprep.mubr.msk.f32.mxu0 %vm640_vm7, %v631_v20 }
 0x202   :  { %1952 = vmatmul.mubr.msk.f32.vlgmr.msra.gmra.mrb[2].mxu0 %vm640_vm7, %v639_v21 }
 0x203   :  { %2021 = vmatpush3.bf16.msra.mxu0 %v2018_v56 }
 0x204   :  { %2023 = vmatprep.subr.bf16.mxu0 %v2022_v59 }
 0x207   :  { %2025 = vmatpush3.bf16.msra.mxu0 %v2022_v59 }
 0x2d5   :  { %v1953_v22 = vpop.f32.mrb[2].mxu0 }
 0x2d6   :  { %v711_v23 = vpop.f32.mrb[3].mxu0  ;;  %v745_v24 = vrot.slane %v1953_v22, %v2172_v16 }
 0x2d7   :  { %v722_v25 = vcombine.high %v711_v23, %v711_v23  ;;  %v729_v26 = vrot.slane %v711_v23, %v2172_v16 }
 0x2d8   :  { %v746_v29 = vcombine.high %v745_v24, %v745_v24 }
 0x2d9   :  { %v736_v27 = vrot.slane %v722_v25, %v2172_v16  ;;  %v737_v28 = vcombine.high %v729_v26, %v729_v26 }
 0x2da   :  { %v777_v37 = vrot.slane %v746_v29, %v2172_v16 }
 0x2db   :  { %v738_v30 = vcombine.high %v736_v27, %v736_v27  ;;  %v747_v31 = vcombine.low %v729_v26, %v737_v28  ;;  %v761_v33 = vrot.slane %v736_v27, %v2172_v16 }
 0x2dd   :  { %v754_v32 = vrot.slane %v747_v31, %v2172_v16  ;;  %v763_v34 = vcombine.low %v738_v30, %v745_v24 }
 0x2df   :  { %v762_v38 = vcombine.low %v754_v32, %v761_v33  ;;  %v770_v40 = vrot.slane %v763_v34, %v2172_v16 }
 0x2e1   :  { %783 = vrot.lane.b32.xlu0 %v762_v38, %s2056_s19  ;;  %v781_v42 = vmul.f32 %v762_v38, %v578_v35  ;;  %v778_v43 = vcombine.low %v770_v40, %v777_v37 }
 0x2e3   :  { %1955 = vmatpush3.msk.msra.mxu1 %vm391_vm4, %v781_v42  ;;  %785 = vrot.lane.b32.xlu1 %v778_v43, %s2056_s19  ;;  %v782_v46 = vmul.f32 %v778_v43, %v578_v35 }
 0x2e4   :  { %1957 = vmatmul.mubr.msk.f32.vlgmr.msra.gmra.mrb[4].mxu1 %vm387_vm5, %v791_v44  ;;  %1959 = vmatprep.subr.mxu1 %v2053_v6 }
 0x2e5   :  { %1224 = vbcast.lane.b32.xlu0 %v1876_v45, 256  ;;  %1960 = vmatpush3.msk.msra.mxu1 %vm391_vm4, %v782_v46 }
 0x2e6   :  { %1961 = vmatprep.mubr.msk.f32.mxu1 %vm2055_vm3, %v2053_v6  ;;  %1975 = vmatprep.subr.mxu1 %v2053_v6 }
 0x2e8   :  { %1962 = vmatmul.mubr.msk.f32.vlgmr.msra.gmra.mrb[6].mxu1 %vm387_vm5, %v792_v47 }
 0x2e9   :  { %1977 = vmatprep.mubr.msk.f32.mxu1 %vm2055_vm3, %v2053_v6 }
 0x353   :  { %v784_v48 = vpop.permute.xlu0 %783 }
 0x354   :  { %v789_v62 = vmul.f32 %v784_v48, %v578_v35 }
 0x355   :  { %v786_v63 = vpop.permute.xlu1 %785 }
 0x356   :  { %v790_v0 = vmul.f32 %v786_v63, %v578_v35  ;;  %v814_v2 = vmul.f32 %v807_v60, %v789_v62 }
 0x357   :  { %v1225_v49 = vpop.permute.xlu0 %1224 }
 0x358   :  { %v1227_v50 = vadd.f32 %v1225_v49, %v2187_v39  ;;  %v1228_v51 = vadd.f32 %v1225_v49, %v2189_v41  ;;  %v815_v9 = vmul.f32 %v812_v61, %v790_v0 }
 0x35a   :  { %1236 = vperm.xlu0 %2041, %v1228_v51   ;;  %1231 = vperm.xlu1 %2040, %v1227_v50  }
 0x35e   :  { %1651 = vbcast.lane.b32.xlu0 %v1883_v52, 256 }
 0x3b7   :  { %v888_v5 = vpop.f32.mrb[4].mxu1 }
 0x3b8   :  { %v889_v7 = vadd.f32 %v888_v5, %v814_v2  ;;  %v1958_v8 = vpop.f32.mrb[5].mxu1 }
 0x3ba   :  { %v978_v11 = vmul.f32 %v889_v7, %v889_v7  ;;  %v968_v14 = vsel %vm541_vm6, %v889_v7, 0.0 }
 0x3bb   :  { %v964_v10 = vpop.f32.mrb[6].mxu1 }
 0x3bc   :  { %v965_v12 = vadd.f32 %v964_v10, %v815_v9  ;;  %v1963_v13 = vpop.f32.mrb[7].mxu1  ;;  %v980_v19 = vsel %vm541_vm6, %v978_v11, 0.0 }
 0x3be   :  { %v969_v15 = vsel %vm541_vm6, %v965_v12, 0.0  ;;  %v979_v17 = vmul.f32 %v965_v12, %v965_v12 }
 0x3bf   :  { %v970_v18 = vadd.f32 %v969_v15, %v968_v14 }
 0x3c0   :  { %v981_v20 = vsel %vm541_vm6, %v979_v17, 0.0 }
 0x3c1   :  { %v971_v21 = vrot.slane %v970_v18, 4  ;;  %v982_v22 = vadd.f32 %v981_v20, %v980_v19  ;;  %v1004_v20 = vld [vmem:[%s2430_s11] sm:$0x3f] }
 0x3c3   :  { %v972_v23 = vadd.f32 %v971_v21, %v970_v18  ;;  %v983_v24 = vrot.slane %v982_v22, 4  ;;  %v1005_v21 = vld [vmem:[%s2431_s12] sm:$0x3f] }
 0x3c5   :  { %v973_v25 = vrot.slane %v972_v23, 2  ;;  %v984_v26 = vadd.f32 %v983_v24, %v982_v22 }
 0x3c7   :  { %v974_v27 = vadd.f32 %v973_v25, %v972_v23  ;;  %v985_v28 = vrot.slane %v984_v26, 2 }
 0x3c9   :  { %v975_v29 = vrot.slane %v974_v27, 1  ;;  %v986_v30 = vadd.f32 %v985_v28, %v984_v26 }
 0x3cb   :  { %v976_v31 = vadd.f32 %v975_v29, %v974_v27  ;;  %v987_v32 = vrot.slane %v986_v30, 1  ;;  %v1216_v27 = vadd.f32 %v1005_v21, %v2196_v55  ;;  %v1217_v29 = vadd.f32 %v1005_v21, %v2208_v1 }
 0x3cd   :  { %v977_v33 = vmul.f32 0.083333336, %v976_v31  ;;  %v988_v34 = vadd.f32 %v987_v32, %v986_v30  ;;  %v1427_v31 = vld [vmem:[%s2432_s14] sm:$0xff]  ;;  %v1428_v32 = vld [vmem:[%s2432_s14 + $0x8] sm:$0xff] }
 0x3cf   :  { %v989_v35 = vmul.f32 0.083333336, %v988_v34  ;;  %v990_v36 = vmul.f32 %v977_v33, %v977_v33  ;;  %v992_v37 = vsub.f32 %v889_v7, %v977_v33  ;;  %v993_v38 = vsub.f32 %v965_v12, %v977_v33  ;;  %v1429_v34 = vld [vmem:[%s2432_s14 + $0x10] sm:$0xff] }
 0x3d0   :  { %v2026_v33 = vpack.c.bf16 %v1428_v32, %v1427_v31 }
 0x3d1   :  { %v991_v40 = vsub.f32 %v989_v35, %v990_v36 }
 0x3d2   :  { %2027 = vmatprep.subr.bf16.mxu0 %v2026_v33 }
 0x3d3   :  { %v994_v42 = vadd.f32 1e-05, %v991_v40 }
 0x3d5   :  { %2046 = vrsqrt.f32 %v994_v42 }
 0x3d9   :  { %v2315_v43 = vpop.permute.xlu0 %1236  ;;  %v1232_v36 = vpop.permute.xlu1 %1231 }
 0x3dd   :  { %v1652_v44 = vpop.permute.xlu0 %1651 }
 0x3de   :  { %v1655_v45 = vadd.f32 %v1652_v44, %v2189_v41  ;;  %v1654_v30 = vadd.f32 %v1652_v44, %v2187_v39  ;;  %v1430_v39 = vld [vmem:[%s2432_s14 + $0x18] sm:$0xff] }
 0x3df   :  { %v2047_v46 = vpop.eup %2046  ;;  %v2030_v35 = vpack.c.bf16 %v1430_v39, %v1429_v34 }
 0x3e0   :  { %v997_v47 = vmul.f32 %v2047_v46, %v993_v38  ;;  %1663 = vperm.xlu0 %2041, %v1655_v45   ;;  %v996_v48 = vmul.f32 %v2047_v46, %v992_v37 }
 0x3e2   :  { %v999_v49 = vmax.f32 %v997_v47, 0.0  ;;  %v998_v50 = vmax.f32 %v996_v48, 0.0 }
 0x3e4   :  { %v1025_v51 = vcombine.high %v999_v49, %v999_v49  ;;  %v1032_v52 = vrot.slane %v999_v49, %v2172_v16  ;;  %v1009_v53 = vcombine.high %v998_v50, %v998_v50  ;;  %v1016_v54 = vrot.slane %v998_v50, %v2172_v16 }
 0x3e6   :  { %v1039_v56 = vrot.slane %v1025_v51, %v2172_v16  ;;  %v1040_v57 = vcombine.high %v1032_v52, %v1032_v52  ;;  %v1023_v58 = vrot.slane %v1009_v53, %v2172_v16  ;;  %v1024_v59 = vcombine.high %v1016_v54, %v1016_v54 }
 0x3e8   :  { %v1041_v60 = vcombine.low %v1016_v54, %v1024_v59  ;;  %v1042_v41 = vcombine.low %v1023_v58, %v1032_v52  ;;  %v1058_v61 = vcombine.low %v1040_v57, %v1039_v56 }
 0x3ea   :  { %v1049_v62 = vrot.slane %v1041_v60, %v2172_v16  ;;  %v1056_v63 = vrot.slane %v1042_v41, %v2172_v16  ;;  %v1065_v2 = vrot.slane %v1058_v61, %v2172_v16 }
 0x3ec   :  { %v1057_v0 = vcombine.low %v1049_v62, %v1056_v63 }
 0x3ee   :  { %1972 = vmatprep.mubr.msk.f32.mxu0 %vm640_vm7, %v1057_v0 }
 0x3ef   :  { %1973 = vmatmul.mubr.msk.f32.vlgmr.msra.gmra.mrb[4].mxu0 %vm640_vm7, %v1065_v2 }
 0x3f0   :  { %2029 = vmatpush3.bf16.msra.mxu0 %v2026_v33 }
 0x3f1   :  { %2031 = vmatprep.subr.bf16.mxu0 %v2030_v35 }
 0x3f4   :  { %2033 = vmatpush3.bf16.msra.mxu0 %v2030_v35 }
 0x4c2   :  { %v1974_v5 = vpop.f32.mrb[4].mxu0 }
 0x4c3   :  { %v1136_v7 = vpop.f32.mrb[5].mxu0  ;;  %v1170_v8 = vrot.slane %v1974_v5, %v2172_v16 }
 0x4c4   :  { %v1147_v9 = vcombine.high %v1136_v7, %v1136_v7  ;;  %v1154_v10 = vrot.slane %v1136_v7, %v2172_v16 }
 0x4c5   :  { %v1171_v13 = vcombine.high %v1170_v8, %v1170_v8 }
 0x4c6   :  { %v1161_v11 = vrot.slane %v1147_v9, %v2172_v16  ;;  %v1162_v12 = vcombine.high %v1154_v10, %v1154_v10 }
 0x4c7   :  { %v1202_v22 = vrot.slane %v1171_v13, %v2172_v16 }
 0x4c8   :  { %v1163_v14 = vcombine.high %v1161_v11, %v1161_v11  ;;  %v1172_v15 = vcombine.low %v1154_v10, %v1162_v12  ;;  %v1186_v18 = vrot.slane %v1161_v11, %v2172_v16 }
 0x4ca   :  { %v1179_v17 = vrot.slane %v1172_v15, %v2172_v16  ;;  %v1188_v19 = vcombine.low %v1163_v14, %v1170_v8 }
 0x4cc   :  { %v1187_v23 = vcombine.low %v1179_v17, %v1186_v18  ;;  %v1195_v24 = vrot.slane %v1188_v19, %v2172_v16 }
 0x4ce   :  { %1208 = vrot.lane.b32.xlu1 %v1187_v23, %s2056_s19  ;;  %v1206_v25 = vmul.f32 %v1187_v23, %v1004_v20  ;;  %v1203_v26 = vcombine.low %v1195_v24, %v1202_v22 }
 0x4d0   :  { %1976 = vmatpush3.msk.msra.mxu1 %vm391_vm4, %v1206_v25  ;;  %v1207_v28 = vmul.f32 %v1203_v26, %v1004_v20 }
 0x4d1   :  { %1978 = vmatmul.mubr.msk.f32.vlgmr.msra.gmra.mrb[8].mxu1 %vm387_vm5, %v1216_v27  ;;  %1980 = vmatprep.subr.mxu1 %v2053_v6 }
 0x4d2   :  { %1210 = vrot.lane.b32.xlu1 %v1203_v26, %s2056_s19  ;;  %1981 = vmatpush3.msk.msra.mxu1 %vm391_vm4, %v1207_v28 }
 0x4d3   :  { %1982 = vmatprep.mubr.msk.f32.mxu1 %vm2055_vm3, %v2053_v6  ;;  %1996 = vmatprep.subr.mxu1 %v2053_v6 }
 0x4d5   :  { %1983 = vmatmul.mubr.msk.f32.vlgmr.msra.gmra.mrb[10].mxu1 %vm387_vm5, %v1217_v29 }
 0x4d6   :  { %1658 = vperm.xlu1 %2040, %v1654_v30   ;;  %1998 = vmatprep.mubr.msk.f32.mxu1 %vm2055_vm3, %v2053_v6 }
 0x540   :  { %v1209_v37 = vpop.permute.xlu1 %1208 }
 0x541   :  { %v1214_v38 = vmul.f32 %v1209_v37, %v1004_v20 }
 0x543   :  { %v1239_v44 = vmul.f32 %v1232_v36, %v1214_v38 }
 0x544   :  { %v1211_v40 = vpop.permute.xlu1 %1210 }
 0x545   :  { %v1215_v42 = vmul.f32 %v1211_v40, %v1004_v20 }
 0x547   :  { %v1240_v48 = vmul.f32 %v2315_v43, %v1215_v42 }
 0x5a4   :  { %v1313_v45 = vpop.f32.mrb[8].mxu1 }
 0x5a5   :  { %v1314_v46 = vadd.f32 %v1313_v45, %v1239_v44  ;;  %v1979_v47 = vpop.f32.mrb[9].mxu1 }
 0x5a7   :  { %v1403_v50 = vmul.f32 %v1314_v46, %v1314_v46  ;;  %v1393_v53 = vsel %vm541_vm6, %v1314_v46, 0.0 }
 0x5a8   :  { %v1389_v49 = vpop.f32.mrb[10].mxu1 }
 0x5a9   :  { %v1390_v51 = vadd.f32 %v1389_v49, %v1240_v48  ;;  %v1984_v52 = vpop.f32.mrb[11].mxu1  ;;  %v1405_v58 = vsel %vm541_vm6, %v1403_v50, 0.0 }
 0x5ab   :  { %v1394_v54 = vsel %vm541_vm6, %v1390_v51, 0.0  ;;  %v1404_v56 = vmul.f32 %v1390_v51, %v1390_v51 }
 0x5ac   :  { %v1395_v57 = vadd.f32 %v1394_v54, %v1393_v53  ;;  %v1431_v54 = vld [vmem:[%s2433_s15] sm:$0x3f] }
 0x5ad   :  { %v1406_v59 = vsel %vm541_vm6, %v1404_v56, 0.0  ;;  %v1432_v56 = vld [vmem:[%s2434_s16] sm:$0x3f] }
 0x5ae   :  { %v1396_v60 = vrot.slane %v1395_v57, 4  ;;  %v1407_v41 = vadd.f32 %v1406_v59, %v1405_v58 }
 0x5b0   :  { %v1397_v61 = vadd.f32 %v1396_v60, %v1395_v57  ;;  %v1408_v62 = vrot.slane %v1407_v41, 4 }
 0x5b2   :  { %v1398_v63 = vrot.slane %v1397_v61, 2  ;;  %v1409_v43 = vadd.f32 %v1408_v62, %v1407_v41 }
 0x5b4   :  { %v1399_v0 = vadd.f32 %v1398_v63, %v1397_v61  ;;  %v1410_v2 = vrot.slane %v1409_v43, 2  ;;  %v1643_v61 = vadd.f32 %v1432_v56, %v2196_v55  ;;  %v1659_v63 = vpop.permute.xlu1 %1658 }
 0x5b6   :  { %v1400_v5 = vrot.slane %v1399_v0, 1  ;;  %v1411_v7 = vadd.f32 %v1410_v2, %v1409_v43  ;;  %v1664_v43 = vpop.permute.xlu0 %1663 }
 0x5b8   :  { %v1401_v8 = vadd.f32 %v1400_v5, %v1399_v0  ;;  %v1412_v9 = vrot.slane %v1411_v7, 1 }
 0x5ba   :  { %v1402_v10 = vmul.f32 0.083333336, %v1401_v8  ;;  %v1413_v11 = vadd.f32 %v1412_v9, %v1411_v7 }
 0x5bc   :  { %v1414_v12 = vmul.f32 0.083333336, %v1413_v11  ;;  %v1415_v13 = vmul.f32 %v1402_v10, %v1402_v10  ;;  %v1417_v14 = vsub.f32 %v1314_v46, %v1402_v10  ;;  %v1418_v15 = vsub.f32 %v1390_v51, %v1402_v10 }
 0x5be   :  { %v1416_v17 = vsub.f32 %v1414_v12, %v1415_v13 }
 0x5c0   :  { %v1419_v18 = vadd.f32 1e-05, %v1416_v17 }
 0x5c2   :  { %2048 = vrsqrt.f32 %v1419_v18 }
 0x5cc   :  { %v2049_v19 = vpop.eup %2048 }
 0x5cd   :  { %v1421_v20 = vmul.f32 %v2049_v19, %v1417_v14  ;;  %v1422_v21 = vmul.f32 %v2049_v19, %v1418_v15 }
 0x5cf   :  { %v1423_v22 = vmax.f32 %v1421_v20, 0.0  ;;  %v1424_v23 = vmax.f32 %v1422_v21, 0.0 }
 0x5d1   :  { %v1426_v24 = vadd.f32 %v1424_v23, %v2247_v4  ;;  %v1425_v25 = vadd.f32 %v1423_v22, %v2245_v3 }
 0x5d3   :  { %v1452_v26 = vcombine.high %v1426_v24, %v1426_v24  ;;  %v1459_v27 = vrot.slane %v1426_v24, %v2172_v16  ;;  %v1436_v28 = vcombine.high %v1425_v25, %v1425_v25  ;;  %v1443_v29 = vrot.slane %v1425_v25, %v2172_v16 }
 0x5d5   :  { %v1466_v30 = vrot.slane %v1452_v26, %v2172_v16  ;;  %v1467_v31 = vcombine.high %v1459_v27, %v1459_v27  ;;  %v1450_v32 = vrot.slane %v1436_v28, %v2172_v16  ;;  %v1451_v33 = vcombine.high %v1443_v29, %v1443_v29 }
 0x5d7   :  { %v1468_v34 = vcombine.low %v1443_v29, %v1451_v33  ;;  %v1469_v39 = vcombine.low %v1450_v32, %v1459_v27  ;;  %v1485_v35 = vcombine.low %v1467_v31, %v1466_v30 }
 0x5d9   :  { %v1476_v36 = vrot.slane %v1468_v34, %v2172_v16  ;;  %v1483_v4 = vrot.slane %v1469_v39, %v2172_v16  ;;  %v1492_v37 = vrot.slane %v1485_v35, %v2172_v16 }
 0x5db   :  { %v1484_v3 = vcombine.low %v1476_v36, %v1483_v4 }
 0x5dd   :  { %1993 = vmatprep.mubr.msk.f32.mxu0 %vm640_vm7, %v1484_v3 }
 0x5de   :  { %1994 = vmatmul.mubr.msk.f32.vlgmr.msra.gmra.mrb[6].mxu0 %vm640_vm7, %v1492_v37 }
 0x6b1   :  { %v1995_v38 = vpop.f32.mrb[6].mxu0 }
 0x6b2   :  { %v1563_v40 = vpop.f32.mrb[7].mxu0  ;;  %v1597_v42 = vrot.slane %v1995_v38, %v2172_v16 }
 0x6b3   :  { %v1574_v44 = vcombine.high %v1563_v40, %v1563_v40  ;;  %v1581_v45 = vrot.slane %v1563_v40, %v2172_v16 }
 0x6b4   :  { %v1598_v48 = vcombine.high %v1597_v42, %v1597_v42 }
 0x6b5   :  { %v1588_v46 = vrot.slane %v1574_v44, %v2172_v16  ;;  %v1589_v47 = vcombine.high %v1581_v45, %v1581_v45 }
 0x6b6   :  { %v1629_v57 = vrot.slane %v1598_v48, %v2172_v16 }
 0x6b7   :  { %v1590_v49 = vcombine.high %v1588_v46, %v1588_v46  ;;  %v1599_v50 = vcombine.low %v1581_v45, %v1589_v47  ;;  %v1613_v52 = vrot.slane %v1588_v46, %v2172_v16 }
 0x6b9   :  { %v1606_v51 = vrot.slane %v1599_v50, %v2172_v16  ;;  %v1615_v53 = vcombine.low %v1590_v49, %v1597_v42 }
 0x6bb   :  { %v1614_v58 = vcombine.low %v1606_v51, %v1613_v52  ;;  %v1622_v59 = vrot.slane %v1615_v53, %v2172_v16  ;;  %v1644_v16 = vadd.f32 %v1432_v56, %v2208_v1 }
 0x6bd   :  { %1635 = vrot.lane.b32.xlu1 %v1614_v58, %s2057_s28  ;;  %v1633_v60 = vmul.f32 %v1614_v58, %v1431_v54  ;;  %v1630_v41 = vcombine.low %v1622_v59, %v1629_v57 }
 0x6bf   :  { %1997 = vmatpush3.msk.msra.mxu1 %vm391_vm4, %v1633_v60  ;;  %1637 = vrot.lane.b32.xlu0 %v1630_v41, %s2057_s28  ;;  %v1634_v62 = vmul.f32 %v1630_v41, %v1431_v54 }
 0x6c0   :  { %1999 = vmatmul.mubr.msk.f32.vlgmr.msra.gmra.mrb[12].mxu1 %vm387_vm5, %v1643_v61  ;;  %2001 = vmatprep.subr.mxu1 %v2053_v6 }
 0x6c1   :  { %2002 = vmatpush3.msk.msra.mxu1 %vm391_vm4, %v1634_v62  ;;  %2003 = vmatprep.mubr.msk.f32.mxu1 %vm2055_vm3, %v2053_v6 }
 0x6c4   :  { %2004 = vmatmul.mubr.msk.f32.vlgmr.msra.gmra.mrb[14].mxu1 %vm387_vm5, %v1644_v16 }
 0x72f   :  { %v1636_v55 = vpop.permute.xlu1 %1635 }
 0x730   :  { %v1641_v0 = vmul.f32 %v1636_v55, %v1431_v54 }
 0x731   :  { %v1638_v2 = vpop.permute.xlu0 %1637 }
 0x732   :  { %v1642_v5 = vmul.f32 %v1638_v2, %v1431_v54  ;;  %v1666_v7 = vmul.f32 %v1659_v63, %v1641_v0 }
 0x734   :  { %v1667_v11 = vmul.f32 %v1664_v43, %v1642_v5 }
 0x793   :  { %v1740_v8 = vpop.f32.mrb[12].mxu1 }
 0x794   :  { %v1741_v9 = vadd.f32 %v1740_v8, %v1666_v7  ;;  %v2000_v10 = vpop.f32.mrb[13].mxu1 }
 0x796   :  { %v1831_v13 = vmul.f32 %v1741_v9, %v1741_v9  ;;  %v1821_v1 = vsel %vm1820_vm8, %v1741_v9, 0.0 }
 0x797   :  { %v1816_v12 = vpop.f32.mrb[14].mxu1 }
 0x798   :  { %v1817_v14 = vadd.f32 %v1816_v12, %v1667_v11  ;;  %v2005_v6 = vpop.f32.mrb[15].mxu1  ;;  %v1833_v19 = vsel %vm1820_vm8, %v1831_v13, 0.0 }
 0x79a   :  { %v1822_v15 = vsel %vm1820_vm8, %v1817_v14, 0.0  ;;  %v1832_v17 = vmul.f32 %v1817_v14, %v1817_v14 }
 0x79b   :  { %v1823_v18 = vadd.f32 %v1822_v15, %v1821_v1 }
 0x79c   :  { %v1834_v20 = vsel %vm1820_vm8, %v1832_v17, 0.0 }
 0x79d   :  { %v1824_v21 = vrot.slane %v1823_v18, 4  ;;  %v1835_v22 = vadd.f32 %v1834_v20, %v1833_v19 }
 0x79f   :  { %v1825_v23 = vadd.f32 %v1824_v21, %v1823_v18  ;;  %v1836_v24 = vrot.slane %v1835_v22, 4 }
 0x7a1   :  { %v1826_v25 = vrot.slane %v1825_v23, 2  ;;  %v1837_v26 = vadd.f32 %v1836_v24, %v1835_v22 }
 0x7a3   :  { %v1827_v27 = vadd.f32 %v1826_v25, %v1825_v23  ;;  %v1838_v28 = vrot.slane %v1837_v26, 2 }
 0x7a5   :  { %v1828_v29 = vrot.slane %v1827_v27, 1  ;;  %v1839_v30 = vadd.f32 %v1838_v28, %v1837_v26 }
 0x7a7   :  { %v1829_v31 = vadd.f32 %v1828_v29, %v1827_v27  ;;  %v1840_v32 = vrot.slane %v1839_v30, 1 }
 0x7a9   :  { %v1830_v33 = vmul.f32 0.083333336, %v1829_v31  ;;  %v1841_v34 = vadd.f32 %v1840_v32, %v1839_v30 }
 0x7ab   :  { %v1842_v39 = vmul.f32 0.083333336, %v1841_v34  ;;  %v1843_v35 = vmul.f32 %v1830_v33, %v1830_v33  ;;  %v1845_v36 = vsub.f32 %v1741_v9, %v1830_v33  ;;  %v1846_v4 = vsub.f32 %v1817_v14, %v1830_v33 }
 0x7ad   :  { %v1844_v3 = vsub.f32 %v1842_v39, %v1843_v35 }
 0x7af   :  { %v1847_v37 = vadd.f32 1e-05, %v1844_v3 }
 0x7b1   :  { %2050 = vrsqrt.f32 %v1847_v37 }
 0x7bb   :  { %v2051_v38 = vpop.eup %2050 }
 0x7bc   :  { %v1849_v40 = vmul.f32 %v2051_v38, %v1845_v36  ;;  %v1850_v42 = vmul.f32 %v2051_v38, %v1846_v4 }
 0x7be   :  { %v1851_v44 = vmax.f32 %v1849_v40, 0.0  ;;  %v1852_v45 = vmax.f32 %v1850_v42, 0.0 }
 0x7c0   :  { %1853 = vst.msk [vmem:[%s2435_s18] sm:$0x3f] %vm1820_vm8, %v1851_v44  ;;  %1854 = vst.msk [vmem:[%s2435_s18 + $0x8] sm:$0x3f] %vm1820_vm8, %v1852_v45 }

</bundles_post_ra>
